<compile_context>
chip_gen: v6e
topology: v6e:2x2x1
jax: 0.10.0
libtpu: 0.0.40
codegen_flags: <defaults>
</compile_context>

<pallas_src>
import functools

import jax
import jax.numpy as jnp
from jax.experimental import pallas as pl
from jax.experimental.pallas import tpu as pltpu


def _round_up(x, m):
    return ((x + m - 1) // m) * m


def self_output_kernel(x_ref, res_ref, w_ref, b_ref, gamma_ref, beta_ref, o_ref,
                       *, eps, hidden_size):
    # x_ref, res_ref: (TM, Hp) row tiles.   w_ref: (Hp, Hp) in PyTorch (out, in) layout.
    # b_ref / gamma_ref / beta_ref: (1, Hp).
    # Linear: y = x @ W^T + b  -- native-dtype operands, f32 accumulation on the MXU.
    h = jax.lax.dot_general(
        x_ref[...], w_ref[...],
        dimension_numbers=(((1,), (1,)), ((), ())),   # contract x's in-dim with W's in-dim
        preferred_element_type=jnp.float32)
    h = h + b_ref[...].astype(jnp.float32)

    # Dropout: module evaluated in inference mode -> identity.
    # TODO(synk): training-mode dropout would use pltpu.prng_seed / prng_random_bits.

    # Residual add.
    h = h + res_ref[...].astype(jnp.float32)

    # LayerNorm over the true hidden width. Padded columns are exactly zero
    # (zero-padded W rows, zero bias / residual padding), so a single pass of
    # sum + sum-of-squares divided by the real H gives exact statistics.
    inv_h = jnp.float32(1.0 / hidden_size)
    s = jnp.sum(h, axis=-1, keepdims=True)
    ss = jnp.sum(h * h, axis=-1, keepdims=True)
    mean = s * inv_h
    var = ss * inv_h - mean * mean
    inv = jax.lax.rsqrt(var + eps)
    out = (h - mean) * inv * gamma_ref[...].astype(jnp.float32) \
          + beta_ref[...].astype(jnp.float32)

    o_ref[...] = out.astype(o_ref.dtype)


def self_output(hidden_states, input_tensor, w, b, gamma, beta, *,
                eps=1e-5, block_m=256):
    """Fused SelfOutput forward.

    hidden_states, input_tensor: (B, S, H)
    w: (H, H) PyTorch Linear weight, shape (out, in)  (NOT transposed here)
    b, gamma, beta: (H,)
    """
    B, S, H = hidden_states.shape
    M = B * S
    dtype = hidden_states.dtype

    # Lane-align hidden (128) and sublane-align the row tile (8 for f32).
    Hp = _round_up(H, 128)
    TM = min(block_m, _round_up(M, 8))
    Mp = _round_up(M, TM)

    def pad2(a, rows, cols):
        pr, pc = rows - a.shape[0], cols - a.shape[1]
        if pr or pc:
            a = jnp.pad(a, ((0, pr), (0, pc)))
        return a

    x2d = pad2(hidden_states.reshape(M, H), Mp, Hp)
    r2d = pad2(input_tensor.reshape(M, H), Mp, Hp)
    w2d = pad2(w, Hp, Hp)                          # keep (out, in) layout; no transpose
    b2d = pad2(b.reshape(1, H), 1, Hp)
    g2d = pad2(gamma.reshape(1, H), 1, Hp)
    be2d = pad2(beta.reshape(1, H), 1, Hp)

    kernel = functools.partial(self_output_kernel, eps=eps, hidden_size=H)

    itemsize = jnp.dtype(dtype).itemsize
    cost = pl.CostEstimate(
        flops=2 * M * H * H,
        transcendentals=0,
        bytes_accessed=(x2d.size + r2d.size + w2d.size + Mp * Hp) * itemsize,
    )

    out2d = pl.pallas_call(
        kernel,
        out_shape=jax.ShapeDtypeStruct((Mp, Hp), dtype),
        grid_spec=pltpu.PrefetchScalarGridSpec(
            num_scalar_prefetch=0,
            grid=(Mp // TM,),
            in_specs=[
                pl.BlockSpec((TM, Hp), lambda i: (i, 0)),   # hidden_states row tile
                pl.BlockSpec((TM, Hp), lambda i: (i, 0)),   # residual row tile
                pl.BlockSpec((Hp, Hp), lambda i: (0, 0)),   # weight, resident across steps
                pl.BlockSpec((1, Hp), lambda i: (0, 0)),    # bias
                pl.BlockSpec((1, Hp), lambda i: (0, 0)),    # ln gamma
                pl.BlockSpec((1, Hp), lambda i: (0, 0)),    # ln beta
            ],
            out_specs=pl.BlockSpec((TM, Hp), lambda i: (i, 0)),
        ),
        compiler_params=pltpu.CompilerParams(
            dimension_semantics=("parallel",)),             # independent row tiles
        cost_estimate=cost,
    )(x2d, r2d, w2d, b2d, g2d, be2d)

    return out2d[:M, :H].reshape(B, S, H)


def _reference(hidden_states, input_tensor, w, b, gamma, beta, eps=1e-5):
    h = jnp.einsum("bsh,oh->bso", hidden_states, w) + b
    h = h + input_tensor
    mean = jnp.mean(h, axis=-1, keepdims=True)
    var = jnp.mean((h - mean) ** 2, axis=-1, keepdims=True)
    return (h - mean) * jax.lax.rsqrt(var + eps) * gamma + beta


if __name__ == "__main__":
    B, S, H = 2, 8, 32
    key = jax.random.PRNGKey(0)
    k1, k2, k3, k4, k5, k6 = jax.random.split(key, 6)

    hidden_states = jax.random.normal(k1, (B, S, H), dtype=jnp.float32)
    input_tensor = jax.random.normal(k2, (B, S, H), dtype=jnp.float32)

    # Deterministic parameter init (shapes from nn.Linear(H, H) and nn.LayerNorm(H))
    w = jax.random.normal(k3, (H, H), dtype=jnp.float32) * (1.0 / jnp.sqrt(H))  # (out, in)
    b = jax.random.normal(k4, (H,), dtype=jnp.float32) * 0.01
    gamma = 1.0 + 0.1 * jax.random.normal(k5, (H,), dtype=jnp.float32)
    beta = 0.1 * jax.random.normal(k6, (H,), dtype=jnp.float32)

    out = self_output(hidden_states, input_tensor, w, b, gamma, beta, eps=1e-5)
    out = jax.block_until_ready(out)

    ref = _reference(hidden_states, input_tensor, w, b, gamma, beta, eps=1e-5)
    assert out.shape == (B, S, H)
    assert jnp.allclose(out, ref, atol=1e-4, rtol=1e-4), "mismatch vs reference"

    print("KERNEL_OK")
</pallas_src>

<mosaic_0001>
module attributes {stable_mosaic.version = 11 : i64} {
  func.func @self_output_kernel(%arg0: i32, %arg1: memref<16x128xf32, #tpu.memory_space<vmem>>, %arg2: memref<16x128xf32, #tpu.memory_space<vmem>>, %arg3: memref<128x128xf32, #tpu.memory_space<vmem>>, %arg4: memref<1x128xf32, #tpu.memory_space<vmem>>, %arg5: memref<1x128xf32, #tpu.memory_space<vmem>>, %arg6: memref<1x128xf32, #tpu.memory_space<vmem>>, %arg7: memref<16x128xf32, #tpu.memory_space<vmem>>) attributes {dimension_semantics = [#tpu.dimension_semantics<parallel>], iteration_bounds = array<i64: 1>, scalar_prefetch = 0 : i64, scratch_operands = 0 : i64, tpu.core_type = #tpu.core_type<tc>, window_params = [{transform_indices = @transform_0, window_bounds = array<i64: 16, 128>}, {transform_indices = @transform_1, window_bounds = array<i64: 16, 128>}, {pipeline_mode = #tpu.pipeline_mode<synchronous>, transform_indices = @transform_2, window_bounds = array<i64: 128, 128>}, {pipeline_mode = #tpu.pipeline_mode<synchronous>, transform_indices = @transform_3, window_bounds = array<i64: 1, 128>}, {pipeline_mode = #tpu.pipeline_mode<synchronous>, transform_indices = @transform_4, window_bounds = array<i64: 1, 128>}, {pipeline_mode = #tpu.pipeline_mode<synchronous>, transform_indices = @transform_5, window_bounds = array<i64: 1, 128>}, {transform_indices = @transform_6, window_bounds = array<i64: 16, 128>}]} {
    %c0 = arith.constant 0 : index
    %c0_0 = arith.constant 0 : index
    %0 = vector.load %arg1[%c0, %c0_0] : memref<16x128xf32, #tpu.memory_space<vmem>>, vector<16x128xf32>
    %c0_1 = arith.constant 0 : index
    %c0_2 = arith.constant 0 : index
    %1 = vector.load %arg3[%c0_1, %c0_2] : memref<128x128xf32, #tpu.memory_space<vmem>>, vector<128x128xf32>
    %cst = arith.constant dense<0.000000e+00> : vector<16x128xf32>
    %2 = tpu.matmul %0, %1, %cst {dimension_numbers = #tpu.dot_dimension_numbers<[1], [1], [0], [0], [0, 0, 1, 0], [], []>} : vector<16x128xf32>, vector<128x128xf32>, vector<16x128xf32> -> vector<16x128xf32>
    %c0_3 = arith.constant 0 : index
    %c0_4 = arith.constant 0 : index
    %3 = vector.load %arg4[%c0_3, %c0_4] : memref<1x128xf32, #tpu.memory_space<vmem>>, vector<1x128xf32>
    %4 = vector.broadcast %3 : vector<1x128xf32> to vector<16x128xf32>
    %5 = arith.addf %2, %4 : vector<16x128xf32>
    %c0_5 = arith.constant 0 : index
    %c0_6 = arith.constant 0 : index
    %6 = vector.load %arg2[%c0_5, %c0_6] : memref<16x128xf32, #tpu.memory_space<vmem>>, vector<16x128xf32>
    %7 = arith.addf %5, %6 : vector<16x128xf32>
    %cst_7 = arith.constant dense<0.000000e+00> : vector<16xf32>
    %8 = vector.multi_reduction <add>, %7, %cst_7 [1] : vector<16x128xf32> to vector<16xf32>
    %9 = vector.shape_cast %8 : vector<16xf32> to vector<16x1xf32>
    %10 = arith.mulf %7, %7 : vector<16x128xf32>
    %cst_8 = arith.constant dense<0.000000e+00> : vector<16xf32>
    %11 = vector.multi_reduction <add>, %10, %cst_8 [1] : vector<16x128xf32> to vector<16xf32>
    %12 = vector.shape_cast %11 : vector<16xf32> to vector<16x1xf32>
    %cst_9 = arith.constant 3.125000e-02 : f32
    %13 = vector.broadcast %cst_9 : f32 to vector<16x1xf32>
    %14 = arith.mulf %9, %13 : vector<16x1xf32>
    %cst_10 = arith.constant 3.125000e-02 : f32
    %15 = vector.broadcast %cst_10 : f32 to vector<16x1xf32>
    %16 = arith.mulf %12, %15 : vector<16x1xf32>
    %17 = arith.mulf %14, %14 : vector<16x1xf32>
    %18 = arith.subf %16, %17 : vector<16x1xf32>
    %cst_11 = arith.constant 9.99999974E-6 : f32
    %19 = vector.broadcast %cst_11 : f32 to vector<16x1xf32>
    %20 = arith.addf %18, %19 : vector<16x1xf32>
    %21 = math.rsqrt %20 : vector<16x1xf32>
    %22 = vector.broadcast %14 : vector<16x1xf32> to vector<16x128xf32>
    %23 = arith.subf %7, %22 : vector<16x128xf32>
    %24 = vector.broadcast %21 : vector<16x1xf32> to vector<16x128xf32>
    %25 = arith.mulf %23, %24 : vector<16x128xf32>
    %c0_12 = arith.constant 0 : index
    %c0_13 = arith.constant 0 : index
    %26 = vector.load %arg5[%c0_12, %c0_13] : memref<1x128xf32, #tpu.memory_space<vmem>>, vector<1x128xf32>
    %27 = vector.broadcast %26 : vector<1x128xf32> to vector<16x128xf32>
    %28 = arith.mulf %25, %27 : vector<16x128xf32>
    %c0_14 = arith.constant 0 : index
    %c0_15 = arith.constant 0 : index
    %29 = vector.load %arg6[%c0_14, %c0_15] : memref<1x128xf32, #tpu.memory_space<vmem>>, vector<1x128xf32>
    %30 = vector.broadcast %29 : vector<1x128xf32> to vector<16x128xf32>
    %31 = arith.addf %28, %30 : vector<16x128xf32>
    %c0_16 = arith.constant 0 : index
    %c0_17 = arith.constant 0 : index
    %32 = vector.load %arg7[%c0_16, %c0_17] : memref<16x128xf32, #tpu.memory_space<vmem>>, vector<16x128xf32>
    tpu.vector_store %arg7[%c0_16, %c0_17], %31 {strides = array<i32>} : memref<16x128xf32, #tpu.memory_space<vmem>>, vector<16x128xf32>,
    return
  }
  func.func @transform_0(%arg0: i32) -> (i32, i32) {
    %c0_i32 = arith.constant 0 : i32
    %c0_i32_0 = arith.constant 0 : i32
    return %arg0, %c0_i32 : i32, i32
  }
  func.func @transform_1(%arg0: i32) -> (i32, i32) {
    %c0_i32 = arith.constant 0 : i32
    %c0_i32_0 = arith.constant 0 : i32
    return %arg0, %c0_i32 : i32, i32
  }
  func.func @transform_2(%arg0: i32) -> (i32, i32) {
    %c0_i32 = arith.constant 0 : i32
    %c0_i32_0 = arith.constant 0 : i32
    %c0_i32_1 = arith.constant 0 : i32
    return %c0_i32, %c0_i32_0 : i32, i32
  }
  func.func @transform_3(%arg0: i32) -> (i32, i32) {
    %c0_i32 = arith.constant 0 : i32
    %c0_i32_0 = arith.constant 0 : i32
    %c0_i32_1 = arith.constant 0 : i32
    return %c0_i32, %c0_i32_0 : i32, i32
  }
  func.func @transform_4(%arg0: i32) -> (i32, i32) {
    %c0_i32 = arith.constant 0 : i32
    %c0_i32_0 = arith.constant 0 : i32
    %c0_i32_1 = arith.constant 0 : i32
    return %c0_i32, %c0_i32_0 : i32, i32
  }
  func.func @transform_5(%arg0: i32) -> (i32, i32) {
    %c0_i32 = arith.constant 0 : i32
    %c0_i32_0 = arith.constant 0 : i32
    %c0_i32_1 = arith.constant 0 : i32
    return %c0_i32, %c0_i32_0 : i32, i32
  }
  func.func @transform_6(%arg0: i32) -> (i32, i32) {
    %c0_i32 = arith.constant 0 : i32
    %c0_i32_0 = arith.constant 0 : i32
    return %arg0, %c0_i32 : i32, i32
  }
}

</mosaic_0001>

<bundles_post_ra>
// kernel: tpu_custom_call.1
= control target key start
LH: loop header
LB: loop body
LE: loop exit
PB: predicated region body
PF: predicated region fallthrough
CT: control target
= control target key end

     0   :  { %11 = vsyncpa [#allocation3], 0  ;;  %s459_s0 = inlined_call_operand.hbm [shape: f32[16,128], index: 0, kind: input, shape index: {}]   ;;  %s460_s1 = inlined_call_operand.hbm [shape: f32[16,128], index: 1, kind: input, shape index: {}]   ;;  %s461_s2 = inlined_call_operand.hbm [shape: f32[128,128], index: 2, kind: input, shape index: {}]   ;;  %s462_s3 = inlined_call_operand.vmem [shape: f32[1,128], index: 3, kind: input, shape index: {}]   ;;  %s463_s4 = inlined_call_operand.vmem [shape: f32[1,128], index: 4, kind: input, shape index: {}]   ;;  %s464_s5 = inlined_call_operand.vmem [shape: f32[1,128], index: 5, kind: input, shape index: {}]   ;;  %s465_s6 = inlined_call_operand.hbm [shape: f32[16,128], index: 6, kind: output, shape index: {}]  }
   0x1   :  { %12 = vsyncpa [#allocation6], 0 }
   0x2   :  { %13 = vsyncpa [#allocation4], 0  ;;  %s385_s21 = smov [#allocation5]   ;;  %s386_s23 = smov [#allocation2]  }
   0x3   :  { %s31_s22 = sshll.u32 %s385_s21, 4  ;;  %s19_s24 = sshll.u32 %s386_s23, 4  ;;  %s32_s22 = int_to_ptr.vmem [resolvable:$true] %s31_s22  ;;  %s20_s24 = int_to_ptr.vmem [resolvable:$true] %s19_s24 }
   0x4   :  { %s307_s25 = scalar_lea.vmem %s32_s22, 256  ;;  %p312_p1 = scmp.lt.s32.totalorder %s32_s22, %s32_s22 }
   0x5   :  { %p308_p0 = scmp.ne.s32.totalorder %s32_s22, %s307_s25  ;;  %p313_p2 = scmp.lt.s32.totalorder %s307_s25, %s307_s25 }
   0x7   :  { %p314_p3 = por %p313_p2, %p312_p1 }
   0x9   :  { %p315_p4 = pnand %p314_p3, %p308_p0 }
   0xb   :  { %318 = shalt.err (!%p315_p4)
}
   0xc   :  { %s387_s26 = smov 128   ;;  %s388_s27 = smov 8  }
   0xd   :  { %37 = dma.hbm_to_vmem [thread:$0]  %s460_s1, 256, %s32_s22, [#allocation6], %s387_s26, %s387_s26, %s388_s27  }
   0xe   :  { %s327_s30 = scalar_lea.vmem %s20_s24, 256  ;;  %p332_p6 = scmp.lt.s32.totalorder %s20_s24, %s20_s24 }
   0xf   :  { %p328_p5 = scmp.ne.s32.totalorder %s20_s24, %s327_s30  ;;  %p333_p7 = scmp.lt.s32.totalorder %s327_s30, %s327_s30 }
  0x11   :  { %p334_p8 = por %p333_p7, %p332_p6 }
  0x13   :  { %p335_p9 = pnand %p334_p8, %p328_p5 }
  0x15   :  { %338 = shalt.err (!%p335_p9)
}
  0x16   :  { %25 = dma.hbm_to_vmem [thread:$0]  %s459_s0, 256, %s20_s24, [#allocation3], %s387_s26, %s387_s26, %s388_s27  }
  0x17   :  { %s389_s9 = smov [#allocation7]  }
  0x18   :  { %s43_s10 = sshll.u32 %s389_s9, 4  ;;  %s44_s10 = int_to_ptr.vmem [resolvable:$true] %s43_s10 }
  0x19   :  { %s347_s11 = scalar_lea.vmem %s44_s10, 2048  ;;  %p352_p11 = scmp.lt.s32.totalorder %s44_s10, %s44_s10 }
  0x1a   :  { %p348_p10 = scmp.ne.s32.totalorder %s44_s10, %s347_s11  ;;  %p353_p12 = scmp.lt.s32.totalorder %s347_s11, %s347_s11 }
  0x1c   :  { %p354_p13 = por %p353_p12, %p352_p11 }
  0x1e   :  { %p355_p0 = pnand %p354_p13, %p348_p10 }
  0x20   :  { %358 = shalt.err (!%p355_p0)
}
  0x21   :  { %49 = dma.hbm_to_vmem [thread:$0]  %s461_s2, 2048, %s44_s10, [#allocation6], %s387_s26, %s387_s26, %s388_s27  }
  0x22   :  { %379 = dma.done.wait [#allocation3], 256  }
  0x23   :  { %380 = vsyncadd [#allocation3], 4294967040 }
  0x24   :  { %381 = dma.done.wait [#allocation6], 2304  }
  0x25   :  { %382 = vsyncadd [#allocation6], 4294964992  ;;  %v82_v0 = vld [vmem:[#allocation7 + $0x78] sm:$0xff]  ;;  %v81_v1 = vld [vmem:[#allocation7 + $0x70] sm:$0xff]  ;;  %s390_s16 = smov [#allocation8]  }
  0x26   :  { %254 = vmatprep.subr.mxu0 %v82_v0  ;;  %v80_v2 = vld [vmem:[#allocation7 + $0x68] sm:$0xff]  ;;  %v65_v3 = vld [vmem:[#allocation2] sm:$0xff]  ;;  %v78_v5 = vld [vmem:[#allocation7 + $0x58] sm:$0xff]  ;;  %s220_s17 = sshll.u32 %s390_s16, 4  ;;  %s221_s17 = int_to_ptr.vmem [resolvable:$true] %s220_s17 }
  0x27   :  { %255 = vmatpush3.xpose.msra.mxu0 %v82_v0  ;;  %286 = vmatprep.mubr.f32.mxu0 %v65_v3  ;;  %v79_v4 = vld [vmem:[#allocation7 + $0x60] sm:$0xff]  ;;  %v77_v6 = vld [vmem:[#allocation7 + $0x50] sm:$0xff]  ;;  %v76_v7 = vld [vmem:[#allocation7 + $0x48] sm:$0xff]  ;;  %s359_s18 = scalar_lea.vmem %s221_s17, 256  ;;  %p364_p2 = scmp.lt.s32.totalorder %s221_s17, %s221_s17 }
  0x28   :  { %256 = vmatprep.subr.mxu0 %v81_v1  ;;  %v75_v8 = vld [vmem:[#allocation7 + $0x40] sm:$0xff]  ;;  %v74_v9 = vld [vmem:[#allocation7 + $0x38] sm:$0xff]  ;;  %v73_v10 = vld [vmem:[#allocation7 + $0x30] sm:$0xff]  ;;  %p360_p1 = scmp.ne.s32.totalorder %s221_s17, %s359_s18  ;;  %p365_p3 = scmp.lt.s32.totalorder %s359_s18, %s359_s18 }
  0x29   :  { %v72_v11 = vld [vmem:[#allocation7 + $0x28] sm:$0xff]  ;;  %v71_v12 = vld [vmem:[#allocation7 + $0x20] sm:$0xff]  ;;  %v70_v13 = vld [vmem:[#allocation7 + $0x18] sm:$0xff] }
  0x2a   :  { %v69_v14 = vld [vmem:[#allocation7 + $0x10] sm:$0xff]  ;;  %v68_v15 = vld [vmem:[#allocation7 + $0x8] sm:$0xff]  ;;  %v67_v16 = vld [vmem:[#allocation7] sm:$0xff]  ;;  %p366_p4 = por %p365_p3, %p364_p2 }
  0x2b   :  { %257 = vmatpush3.xpose.msra.mxu0 %v81_v1  ;;  %v66_v17 = vld [vmem:[#allocation2 + $0x8] sm:$0xff]  ;;  %v233_v19 = vld [vmem:[%s462_s3] ss:$0 sm:$0xff]  ;;  %v165_v21 = vld [vmem:[#allocation5] sm:$0xff] }
  0x2c   :  { %258 = vmatprep.subr.mxu0 %v80_v2  ;;  %v166_v24 = vld [vmem:[#allocation5 + $0x8] sm:$0xff]  ;;  %v234_v45 = vld [vmem:[%s463_s4] ss:$0 sm:$0xff]  ;;  %p367_p5 = pnand %p366_p4, %p360_p1 }
  0x2d   :  { %v235_v47 = vld [vmem:[%s464_s5] ss:$0 sm:$0xff] }
  0x2f   :  { %259 = vmatpush3.xpose.msra.mxu0 %v80_v2 }
  0x30   :  { %260 = vmatprep.subr.mxu0 %v79_v4 }
  0x33   :  { %261 = vmatpush3.xpose.msra.mxu0 %v79_v4 }
  0x34   :  { %262 = vmatprep.subr.mxu0 %v78_v5 }
  0x37   :  { %263 = vmatpush3.xpose.msra.mxu0 %v78_v5 }
  0x38   :  { %264 = vmatprep.subr.mxu0 %v77_v6 }
  0x3b   :  { %265 = vmatpush3.xpose.msra.mxu0 %v77_v6 }
  0x3c   :  { %266 = vmatprep.subr.mxu0 %v76_v7 }
  0x3f   :  { %267 = vmatpush3.xpose.msra.mxu0 %v76_v7 }
  0x40   :  { %268 = vmatprep.subr.mxu0 %v75_v8 }
  0x43   :  { %269 = vmatpush3.xpose.msra.mxu0 %v75_v8 }
  0x44   :  { %270 = vmatprep.subr.mxu0 %v74_v9 }
  0x47   :  { %271 = vmatpush3.xpose.msra.mxu0 %v74_v9 }
  0x48   :  { %272 = vmatprep.subr.mxu0 %v73_v10 }
  0x4b   :  { %273 = vmatpush3.xpose.msra.mxu0 %v73_v10 }
  0x4c   :  { %274 = vmatprep.subr.mxu0 %v72_v11 }
  0x4f   :  { %275 = vmatpush3.xpose.msra.mxu0 %v72_v11 }
  0x50   :  { %276 = vmatprep.subr.mxu0 %v71_v12 }
  0x53   :  { %277 = vmatpush3.xpose.msra.mxu0 %v71_v12 }
  0x54   :  { %278 = vmatprep.subr.mxu0 %v70_v13 }
  0x57   :  { %279 = vmatpush3.xpose.msra.mxu0 %v70_v13 }
  0x58   :  { %280 = vmatprep.subr.mxu0 %v69_v14 }
  0x5b   :  { %281 = vmatpush3.xpose.msra.mxu0 %v69_v14 }
  0x5c   :  { %282 = vmatprep.subr.mxu0 %v68_v15 }
  0x5f   :  { %283 = vmatpush3.xpose.msra.mxu0 %v68_v15 }
  0x60   :  { %284 = vmatprep.subr.mxu0 %v67_v16 }
  0x63   :  { %285 = vmatpush3.xpose.msra.mxu0 %v67_v16 }
  0x66   :  { %287 = vmatmul.mubr.f32.vlgmr.msra.gmra.mxu0 %v66_v17 }
 0x126   :  { %v288_v18 = vpop.f32.mrf.mxu0 }
 0x127   :  { %v162_v22 = vadd.f32 %v288_v18, %v233_v19 }
 0x128   :  { %v156_v20 = vpop.f32.mrf.mxu0 }
 0x129   :  { %v157_v23 = vadd.f32 %v233_v19, %v156_v20  ;;  %v168_v26 = vadd.f32 %v166_v24, %v162_v22 }
 0x12b   :  { %v167_v25 = vadd.f32 %v165_v21, %v157_v23  ;;  %v174_v28 = vmul.f32 %v168_v26, %v168_v26 }
 0x12d   :  { %169 = vadd.xlane.f32.xlu0 %v167_v25  ;;  %v173_v27 = vmul.f32 %v167_v25, %v167_v25 }
 0x12f   :  { %175 = vadd.xlane.f32.xlu1 %v173_v27 }
 0x131   :  { %171 = vadd.xlane.f32.xlu0 %v168_v26 }
 0x133   :  { %177 = vadd.xlane.f32.xlu1 %v174_v28 }
 0x1b6   :  { %v170_v29 = vpop.xlane.xlu0 %169 }
 0x1b7   :  { %v179_v30 = vmul.f32 0.03125, %v170_v29 }
 0x1b8   :  { %v176_v31 = vpop.xlane.xlu1 %175 }
 0x1b9   :  { %v183_v32 = vmul.f32 %v179_v30, %v179_v30  ;;  %v181_v33 = vmul.f32 0.03125, %v176_v31  ;;  %v191_v43 = vsub.f32 %v167_v25, %v179_v30 }
 0x1ba   :  { %v172_v34 = vpop.xlane.xlu0 %171 }
 0x1bb   :  { %v185_v35 = vsub.f32 %v181_v33, %v183_v32  ;;  %v180_v36 = vmul.f32 0.03125, %v172_v34 }
 0x1bc   :  { %v178_v37 = vpop.xlane.xlu1 %177 }
 0x1bd   :  { %v187_v38 = vadd.f32 1e-05, %v185_v35  ;;  %v184_v39 = vmul.f32 %v180_v36, %v180_v36  ;;  %v182_v40 = vmul.f32 0.03125, %v178_v37  ;;  %v192_v48 = vsub.f32 %v168_v26, %v180_v36 }
 0x1bf   :  { %295 = vrsqrt.f32 %v187_v38  ;;  %v186_v41 = vsub.f32 %v182_v40, %v184_v39 }
 0x1c1   :  { %v188_v42 = vadd.f32 1e-05, %v186_v41 }
 0x1c3   :  { %297 = vrsqrt.f32 %v188_v42 }
 0x1cc   :  { %v296_v44 = vpop.eup %295 }
 0x1cd   :  { %v193_v46 = vmul.f32 %v296_v44, %v191_v43 }
 0x1cf   :  { %v202_v49 = vmul.f32 %v234_v45, %v193_v46 }
 0x1d0   :  { %v298_v50 = vpop.eup %297 }
 0x1d1   :  { %v194_v51 = vmul.f32 %v298_v50, %v192_v48  ;;  %v211_v52 = vadd.f32 %v235_v47, %v202_v49 }
 0x1d3   :  { %v203_v53 = vmul.f32 %v234_v45, %v194_v51  ;;  %213 = vst [vmem:[#allocation8] sm:$0xff] %v211_v52 }
 0x1d5   :  { %v212_v54 = vadd.f32 %v235_v47, %v203_v53 }
 0x1d7   :  { %214 = vst [vmem:[#allocation8 + $0x8] sm:$0xff] %v212_v54 }
 0x1d8   :  { %370 = shalt.err (!%p367_p5)
}
 0x1d9   :  { %226 = dma.vmem_to_hbm [thread:$0]  %s221_s17, 256, %s465_s6, [#allocation4], %s387_s26, %s387_s26, %s388_s27  }
 0x1da   :  { %383 = dma.done.wait [#allocation4], 256  }
 0x1db   :  { %384 = vsyncadd [#allocation4], 4294967040 }
 0x1dc   :  { %230 = vsyncpa [#allocation3], 1 }
 0x1dd   :  { %231 = vsyncpa [#allocation6], 1 }
 0x1de   :  { %232 = vsyncpa [#allocation4], 1 }

</bundles_post_ra>
